<compile_context>
chip_gen: v6e
topology: v6e:2x2x1
jax: 0.10.0
libtpu: 0.0.40
codegen_flags: <defaults>
</compile_context>

<pallas_src>
import jax
import jax.numpy as jnp
from jax.experimental import pallas as pl
from jax.experimental.pallas import tpu as pltpu

D_IN, H1, H2, H3, D_OUT = 8, 256, 128, 256, 2
D_OUT_PAD = 128            # lane-dense padded fc4 output width
TB_MAX = 512               # batch tile (multiple of 256 -> MXU-friendly)


def _round_up(x, m):
    return ((x + m - 1) // m) * m


def _mlp_kernel(x_ref,
                w1_ref, b1_ref,
                w2_ref, b2_ref,
                w3_ref, b3_ref,
                w4_ref, b4_ref,
                o_ref):
    # x arrives in f32; cast operand to bf16 for native-rate MXU passes,
    # accumulate in f32, do bias + ReLU in f32 on the VPU.
    x = x_ref[...].astype(jnp.bfloat16)

    # fc1 + ReLU
    h = jnp.dot(x, w1_ref[...], preferred_element_type=jnp.float32) + b1_ref[...]
    h = jnp.maximum(h, 0.0)

    # fc2 + ReLU   (dominant FLOPs)
    h = jnp.dot(h.astype(jnp.bfloat16), w2_ref[...],
                preferred_element_type=jnp.float32) + b2_ref[...]
    h = jnp.maximum(h, 0.0)

    # fc3 + ReLU   (dominant FLOPs)
    h = jnp.dot(h.astype(jnp.bfloat16), w3_ref[...],
                preferred_element_type=jnp.float32) + b3_ref[...]
    h = jnp.maximum(h, 0.0)

    # fc4 (no activation), N padded to 128 for a lane-dense store.
    out = jnp.dot(h.astype(jnp.bfloat16), w4_ref[...],
                  preferred_element_type=jnp.float32) + b4_ref[...]
    o_ref[...] = out.astype(o_ref.dtype)


def neural_net_forward(x, params):
    """x: (B, 8) float32.  params: dict of bf16 weights (in,out) + f32 biases."""
    B = x.shape[0]
    TB = min(TB_MAX, _round_up(B, 8))
    B_pad = _round_up(B, TB)
    if B_pad != B:
        x = jnp.pad(x, ((0, B_pad - B), (0, 0)))

    w1, b1, w2, b2, w3, b3, w4, b4 = (
        params["w1"], params["b1"], params["w2"], params["b2"],
        params["w3"], params["b3"], params["w4"], params["b4"],
    )

    def resident_spec(shape):
        # Whole array, same block every grid step -> stays in VMEM.
        return pl.BlockSpec(shape, lambda i: (0, 0))

    out_pad = pl.pallas_call(
        _mlp_kernel,
        out_shape=jax.ShapeDtypeStruct((B_pad, D_OUT_PAD), jnp.float32),
        grid=(B_pad // TB,),
        in_specs=[
            pl.BlockSpec((TB, D_IN), lambda i: (i, 0)),      # x: batch-tiled
            resident_spec((D_IN, H1)), resident_spec((1, H1)),
            resident_spec((H1, H2)),   resident_spec((1, H2)),
            resident_spec((H2, H3)),   resident_spec((1, H3)),
            resident_spec((H3, D_OUT_PAD)), resident_spec((1, D_OUT_PAD)),
        ],
        out_specs=pl.BlockSpec((TB, D_OUT_PAD), lambda i: (i, 0)),
        compiler_params=pltpu.CompilerParams(
            dimension_semantics=("parallel",)),
    )(x, w1, b1, w2, b2, w3, b3, w4, b4)

    return out_pad[:B, :D_OUT]


def init_params(key):
    """Deterministic init; weights stored bf16 as (in, out) = PyTorch W.T,
    biases f32.  fc4 weight/bias are zero-padded to 128 output lanes."""
    ks = jax.random.split(key, 8)

    def linear(kw, kb, fan_in, fan_out, pad_out=None):
        bound = 1.0 / jnp.sqrt(fan_in)
        w = jax.random.uniform(kw, (fan_in, fan_out), jnp.float32, -bound, bound)
        b = jax.random.uniform(kb, (1, fan_out), jnp.float32, -bound, bound)
        if pad_out is not None and pad_out > fan_out:
            w = jnp.pad(w, ((0, 0), (0, pad_out - fan_out)))
            b = jnp.pad(b, ((0, 0), (0, pad_out - fan_out)))
        return w.astype(jnp.bfloat16), b.astype(jnp.float32)

    w1, b1 = linear(ks[0], ks[1], D_IN, H1)
    w2, b2 = linear(ks[2], ks[3], H1, H2)
    w3, b3 = linear(ks[4], ks[5], H2, H3)
    w4, b4 = linear(ks[6], ks[7], H3, D_OUT, pad_out=D_OUT_PAD)
    return {"w1": w1, "b1": b1, "w2": w2, "b2": b2,
            "w3": w3, "b3": b3, "w4": w4, "b4": b4}


def _reference_forward(x, p):
    """Pure-JAX reference with the same bf16-operand / f32-accumulate math."""
    def dot_bf16(a, w):
        return jnp.dot(a.astype(jnp.bfloat16), w,
                       preferred_element_type=jnp.float32)

    h = jnp.maximum(dot_bf16(x, p["w1"]) + p["b1"], 0.0)
    h = jnp.maximum(dot_bf16(h, p["w2"]) + p["b2"], 0.0)
    h = jnp.maximum(dot_bf16(h, p["w3"]) + p["b3"], 0.0)
    out = dot_bf16(h, p["w4"]) + p["b4"]
    return out[:, :D_OUT]


if __name__ == "__main__":
    key = jax.random.PRNGKey(0)
    k_params, k_x = jax.random.split(key)

    params = init_params(k_params)
    x = jax.random.normal(k_x, (8, D_IN), dtype=jnp.float32)  # batch=8, features=8

    out = neural_net_forward(x, params)
    out = jax.block_until_ready(out)

    ref = _reference_forward(x, params)
    assert out.shape == (8, D_OUT)
    assert jnp.allclose(out, ref, atol=2e-2, rtol=2e-2), (
        f"max abs err = {jnp.max(jnp.abs(out - ref))}")

    print("KERNEL_OK")
</pallas_src>

<mosaic_0001>
module attributes {stable_mosaic.version = 11 : i64} {
  func.func @_mlp_kernel(%arg0: i32, %arg1: memref<8x8xf32, #tpu.memory_space<vmem>>, %arg2: memref<8x256xbf16, #tpu.memory_space<vmem>>, %arg3: memref<1x256xf32, #tpu.memory_space<vmem>>, %arg4: memref<256x128xbf16, #tpu.memory_space<vmem>>, %arg5: memref<1x128xf32, #tpu.memory_space<vmem>>, %arg6: memref<128x256xbf16, #tpu.memory_space<vmem>>, %arg7: memref<1x256xf32, #tpu.memory_space<vmem>>, %arg8: memref<256x128xbf16, #tpu.memory_space<vmem>>, %arg9: memref<1x128xf32, #tpu.memory_space<vmem>>, %arg10: memref<8x128xf32, #tpu.memory_space<vmem>>) attributes {dimension_semantics = [#tpu.dimension_semantics<parallel>], iteration_bounds = array<i64: 1>, scalar_prefetch = 0 : i64, scratch_operands = 0 : i64, tpu.core_type = #tpu.core_type<tc>, window_params = [{transform_indices = @transform_0, window_bounds = array<i64: 8, 8>}, {pipeline_mode = #tpu.pipeline_mode<synchronous>, transform_indices = @transform_1, window_bounds = array<i64: 8, 256>}, {pipeline_mode = #tpu.pipeline_mode<synchronous>, transform_indices = @transform_2, window_bounds = array<i64: 1, 256>}, {pipeline_mode = #tpu.pipeline_mode<synchronous>, transform_indices = @transform_3, window_bounds = array<i64: 256, 128>}, {pipeline_mode = #tpu.pipeline_mode<synchronous>, transform_indices = @transform_4, window_bounds = array<i64: 1, 128>}, {pipeline_mode = #tpu.pipeline_mode<synchronous>, transform_indices = @transform_5, window_bounds = array<i64: 128, 256>}, {pipeline_mode = #tpu.pipeline_mode<synchronous>, transform_indices = @transform_6, window_bounds = array<i64: 1, 256>}, {pipeline_mode = #tpu.pipeline_mode<synchronous>, transform_indices = @transform_7, window_bounds = array<i64: 256, 128>}, {pipeline_mode = #tpu.pipeline_mode<synchronous>, transform_indices = @transform_8, window_bounds = array<i64: 1, 128>}, {transform_indices = @transform_9, window_bounds = array<i64: 8, 128>}]} {
    %c0 = arith.constant 0 : index
    %c0_0 = arith.constant 0 : index
    %0 = vector.load %arg1[%c0, %c0_0] : memref<8x8xf32, #tpu.memory_space<vmem>>, vector<8x8xf32>
    %1 = arith.truncf %0 : vector<8x8xf32> to vector<8x8xbf16>
    %c0_1 = arith.constant 0 : index
    %c0_2 = arith.constant 0 : index
    %2 = vector.load %arg2[%c0_1, %c0_2] : memref<8x256xbf16, #tpu.memory_space<vmem>>, vector<8x256xbf16>
    %cst = arith.constant dense<0.000000e+00> : vector<8x256xf32>
    %3 = tpu.matmul %1, %2, %cst {dimension_numbers = #tpu.dot_dimension_numbers<[1], [0], [0], [1], [0, 0, 1, 1], [], []>} : vector<8x8xbf16>, vector<8x256xbf16>, vector<8x256xf32> -> vector<8x256xf32>
    %c0_3 = arith.constant 0 : index
    %c0_4 = arith.constant 0 : index
    %4 = vector.load %arg3[%c0_3, %c0_4] : memref<1x256xf32, #tpu.memory_space<vmem>>, vector<1x256xf32>
    %5 = vector.broadcast %4 : vector<1x256xf32> to vector<8x256xf32>
    %6 = arith.addf %3, %5 : vector<8x256xf32>
    %cst_5 = arith.constant 0.000000e+00 : f32
    %7 = vector.broadcast %cst_5 : f32 to vector<8x256xf32>
    %8 = arith.maximumf %6, %7 : vector<8x256xf32>
    %9 = arith.truncf %8 : vector<8x256xf32> to vector<8x256xbf16>
    %c0_6 = arith.constant 0 : index
    %c0_7 = arith.constant 0 : index
    %10 = vector.load %arg4[%c0_6, %c0_7] : memref<256x128xbf16, #tpu.memory_space<vmem>>, vector<256x128xbf16>
    %cst_8 = arith.constant dense<0.000000e+00> : vector<8x128xf32>
    %11 = tpu.matmul %9, %10, %cst_8 {dimension_numbers = #tpu.dot_dimension_numbers<[1], [0], [0], [1], [0, 0, 1, 1], [], []>} : vector<8x256xbf16>, vector<256x128xbf16>, vector<8x128xf32> -> vector<8x128xf32>
    %c0_9 = arith.constant 0 : index
    %c0_10 = arith.constant 0 : index
    %12 = vector.load %arg5[%c0_9, %c0_10] : memref<1x128xf32, #tpu.memory_space<vmem>>, vector<1x128xf32>
    %13 = vector.broadcast %12 : vector<1x128xf32> to vector<8x128xf32>
    %14 = arith.addf %11, %13 : vector<8x128xf32>
    %cst_11 = arith.constant 0.000000e+00 : f32
    %15 = vector.broadcast %cst_11 : f32 to vector<8x128xf32>
    %16 = arith.maximumf %14, %15 : vector<8x128xf32>
    %17 = arith.truncf %16 : vector<8x128xf32> to vector<8x128xbf16>
    %c0_12 = arith.constant 0 : index
    %c0_13 = arith.constant 0 : index
    %18 = vector.load %arg6[%c0_12, %c0_13] : memref<128x256xbf16, #tpu.memory_space<vmem>>, vector<128x256xbf16>
    %cst_14 = arith.constant dense<0.000000e+00> : vector<8x256xf32>
    %19 = tpu.matmul %17, %18, %cst_14 {dimension_numbers = #tpu.dot_dimension_numbers<[1], [0], [0], [1], [0, 0, 1, 1], [], []>} : vector<8x128xbf16>, vector<128x256xbf16>, vector<8x256xf32> -> vector<8x256xf32>
    %c0_15 = arith.constant 0 : index
    %c0_16 = arith.constant 0 : index
    %20 = vector.load %arg7[%c0_15, %c0_16] : memref<1x256xf32, #tpu.memory_space<vmem>>, vector<1x256xf32>
    %21 = vector.broadcast %20 : vector<1x256xf32> to vector<8x256xf32>
    %22 = arith.addf %19, %21 : vector<8x256xf32>
    %cst_17 = arith.constant 0.000000e+00 : f32
    %23 = vector.broadcast %cst_17 : f32 to vector<8x256xf32>
    %24 = arith.maximumf %22, %23 : vector<8x256xf32>
    %25 = arith.truncf %24 : vector<8x256xf32> to vector<8x256xbf16>
    %c0_18 = arith.constant 0 : index
    %c0_19 = arith.constant 0 : index
    %26 = vector.load %arg8[%c0_18, %c0_19] : memref<256x128xbf16, #tpu.memory_space<vmem>>, vector<256x128xbf16>
    %cst_20 = arith.constant dense<0.000000e+00> : vector<8x128xf32>
    %27 = tpu.matmul %25, %26, %cst_20 {dimension_numbers = #tpu.dot_dimension_numbers<[1], [0], [0], [1], [0, 0, 1, 1], [], []>} : vector<8x256xbf16>, vector<256x128xbf16>, vector<8x128xf32> -> vector<8x128xf32>
    %c0_21 = arith.constant 0 : index
    %c0_22 = arith.constant 0 : index
    %28 = vector.load %arg9[%c0_21, %c0_22] : memref<1x128xf32, #tpu.memory_space<vmem>>, vector<1x128xf32>
    %29 = vector.broadcast %28 : vector<1x128xf32> to vector<8x128xf32>
    %30 = arith.addf %27, %29 : vector<8x128xf32>
    %c0_23 = arith.constant 0 : index
    %c0_24 = arith.constant 0 : index
    %31 = vector.load %arg10[%c0_23, %c0_24] : memref<8x128xf32, #tpu.memory_space<vmem>>, vector<8x128xf32>
    tpu.vector_store %arg10[%c0_23, %c0_24], %30 {strides = array<i32>} : memref<8x128xf32, #tpu.memory_space<vmem>>, vector<8x128xf32>,
    return
  }
  func.func @transform_0(%arg0: i32) -> (i32, i32) {
    %c0_i32 = arith.constant 0 : i32
    %c0_i32_0 = arith.constant 0 : i32
    return %arg0, %c0_i32 : i32, i32
  }
  func.func @transform_1(%arg0: i32) -> (i32, i32) {
    %c0_i32 = arith.constant 0 : i32
    %c0_i32_0 = arith.constant 0 : i32
    %c0_i32_1 = arith.constant 0 : i32
    return %c0_i32, %c0_i32_0 : i32, i32
  }
  func.func @transform_2(%arg0: i32) -> (i32, i32) {
    %c0_i32 = arith.constant 0 : i32
    %c0_i32_0 = arith.constant 0 : i32
    %c0_i32_1 = arith.constant 0 : i32
    return %c0_i32, %c0_i32_0 : i32, i32
  }
  func.func @transform_3(%arg0: i32) -> (i32, i32) {
    %c0_i32 = arith.constant 0 : i32
    %c0_i32_0 = arith.constant 0 : i32
    %c0_i32_1 = arith.constant 0 : i32
    return %c0_i32, %c0_i32_0 : i32, i32
  }
  func.func @transform_4(%arg0: i32) -> (i32, i32) {
    %c0_i32 = arith.constant 0 : i32
    %c0_i32_0 = arith.constant 0 : i32
    %c0_i32_1 = arith.constant 0 : i32
    return %c0_i32, %c0_i32_0 : i32, i32
  }
  func.func @transform_5(%arg0: i32) -> (i32, i32) {
    %c0_i32 = arith.constant 0 : i32
    %c0_i32_0 = arith.constant 0 : i32
    %c0_i32_1 = arith.constant 0 : i32
    return %c0_i32, %c0_i32_0 : i32, i32
  }
  func.func @transform_6(%arg0: i32) -> (i32, i32) {
    %c0_i32 = arith.constant 0 : i32
    %c0_i32_0 = arith.constant 0 : i32
    %c0_i32_1 = arith.constant 0 : i32
    return %c0_i32, %c0_i32_0 : i32, i32
  }
  func.func @transform_7(%arg0: i32) -> (i32, i32) {
    %c0_i32 = arith.constant 0 : i32
    %c0_i32_0 = arith.constant 0 : i32
    %c0_i32_1 = arith.constant 0 : i32
    return %c0_i32, %c0_i32_0 : i32, i32
  }
  func.func @transform_8(%arg0: i32) -> (i32, i32) {
    %c0_i32 = arith.constant 0 : i32
    %c0_i32_0 = arith.constant 0 : i32
    %c0_i32_1 = arith.constant 0 : i32
    return %c0_i32, %c0_i32_0 : i32, i32
  }
  func.func @transform_9(%arg0: i32) -> (i32, i32) {
    %c0_i32 = arith.constant 0 : i32
    %c0_i32_0 = arith.constant 0 : i32
    return %arg0, %c0_i32 : i32, i32
  }
}

</mosaic_0001>

<bundles_post_ra>
// kernel: tpu_custom_call.1
= control target key start
LH: loop header
LB: loop body
LE: loop exit
PB: predicated region body
PF: predicated region fallthrough
CT: control target
= control target key end

     0   :  { %14 = vsyncpa [#allocation3], 0  ;;  %s1095_s0 = inlined_call_operand.hbm [shape: f32[8,8], index: 0, kind: input, shape index: {}]   ;;  %s1096_s1 = inlined_call_operand.hbm [shape: bf16[8,256], index: 1, kind: input, shape index: {}]   ;;  %s1097_s2 = inlined_call_operand.vmem [shape: f32[1,256], index: 2, kind: input, shape index: {}]   ;;  %s1098_s3 = inlined_call_operand.hbm [shape: bf16[256,128], index: 3, kind: input, shape index: {}]   ;;  %s1099_s4 = inlined_call_operand.vmem [shape: f32[1,128], index: 4, kind: input, shape index: {}]   ;;  %s1100_s5 = inlined_call_operand.hbm [shape: bf16[128,256], index: 5, kind: input, shape index: {}]   ;;  %s1101_s6 = inlined_call_operand.vmem [shape: f32[1,256], index: 6, kind: input, shape index: {}]   ;;  %s1102_s7 = inlined_call_operand.hbm [shape: bf16[256,128], index: 7, kind: input, shape index: {}]   ;;  %s1103_s8 = inlined_call_operand.vmem [shape: f32[1,128], index: 8, kind: input, shape index: {}]   ;;  %s1104_s9 = inlined_call_operand.hbm [shape: f32[8,128], index: 9, kind: output, shape index: {}]  }
   0x1   :  { %15 = vsyncpa [#allocation6], 0 }
   0x2   :  { %16 = vsyncpa [#allocation9], 0 }
   0x3   :  { %17 = vsyncpa [#allocation4], 0  ;;  %s992_s30 = smov [#allocation5]   ;;  %s993_s11 = smov [#allocation8]  }
   0x4   :  { %s34_s10 = sshll.u32 %s992_s30, 4  ;;  %s59_s12 = sshll.u32 %s993_s11, 4  ;;  %s35_s10 = int_to_ptr.vmem [resolvable:$true] %s34_s10  ;;  %s60_s12 = int_to_ptr.vmem [resolvable:$true] %s59_s12 }
   0x5   :  { %s872_s13 = scalar_lea.vmem %s35_s10, 128  ;;  %p877_p1 = scmp.lt.s32.totalorder %s35_s10, %s35_s10 }
   0x6   :  { %p873_p0 = scmp.ne.s32.totalorder %s35_s10, %s872_s13  ;;  %p878_p2 = scmp.lt.s32.totalorder %s872_s13, %s872_s13 }
   0x8   :  { %p879_p3 = por %p878_p2, %p877_p1 }
   0xa   :  { %p880_p4 = pnand %p879_p3, %p873_p0 }
   0xc   :  { %883 = shalt.err (!%p880_p4)
}
   0xd   :  { %37 = dma.hbm_to_vmem [thread:$0]  %s1096_s1, 128, %s35_s10, [#allocation6]  }
   0xe   :  { %s892_s16 = scalar_lea.vmem %s60_s12, 2048  ;;  %p897_p6 = scmp.lt.s32.totalorder %s60_s12, %s60_s12 }
   0xf   :  { %p893_p5 = scmp.ne.s32.totalorder %s60_s12, %s892_s16  ;;  %p898_p7 = scmp.lt.s32.totalorder %s892_s16, %s892_s16 }
  0x11   :  { %p899_p8 = por %p898_p7, %p897_p6 }
  0x13   :  { %p900_p9 = pnand %p899_p8, %p893_p5 }
  0x15   :  { %903 = shalt.err (!%p900_p9)
}
  0x16   :  { %s994_s17 = smov 128   ;;  %s995_s18 = smov 8  }
  0x17   :  { %65 = dma.hbm_to_vmem [thread:$0]  %s1100_s5, 2048, %s60_s12, [#allocation9], %s994_s17, %s994_s17, %s995_s18  }
  0x18   :  { %s996_s21 = smov [#allocation2]   ;;  %s997_s23 = smov [#allocation7]  }
  0x19   :  { %s24_s22 = sshll.u32 %s996_s21, 4  ;;  %s45_s24 = sshll.u32 %s997_s23, 4  ;;  %s25_s22 = int_to_ptr.vmem [resolvable:$true] %s24_s22  ;;  %s46_s24 = int_to_ptr.vmem [resolvable:$true] %s45_s24 }
  0x1a   :  { %s912_s1 = scalar_lea.vmem %s25_s22, 128  ;;  %p917_p11 = scmp.lt.s32.totalorder %s25_s22, %s25_s22 }
  0x1b   :  { %p913_p10 = scmp.ne.s32.totalorder %s25_s22, %s912_s1  ;;  %p918_p12 = scmp.lt.s32.totalorder %s912_s1, %s912_s1 }
  0x1d   :  { %p919_p13 = por %p918_p12, %p917_p11 }
  0x1f   :  { %p920_p0 = pnand %p919_p13, %p913_p10 }
  0x21   :  { %923 = shalt.err (!%p920_p0)
}
  0x22   :  { %27 = dma.hbm_to_vmem [thread:$0]  %s1095_s0, 128, %s25_s22, [#allocation3]  }
  0x23   :  { %s932_s27 = scalar_lea.vmem %s46_s24, 2048  ;;  %p937_p2 = scmp.lt.s32.totalorder %s46_s24, %s46_s24 }
  0x24   :  { %p933_p1 = scmp.ne.s32.totalorder %s46_s24, %s932_s27  ;;  %p938_p3 = scmp.lt.s32.totalorder %s932_s27, %s932_s27 }
  0x26   :  { %p939_p4 = por %p938_p3, %p937_p2 }
  0x28   :  { %p940_p5 = pnand %p939_p4, %p933_p1 }
  0x2a   :  { %943 = shalt.err (!%p940_p5)
}
  0x2b   :  { %s998_s5 = smov 64   ;;  %s999_s28 = smov 4  }
  0x2c   :  { %51 = dma.hbm_to_vmem [thread:$0]  %s1098_s3, 2048, %s46_s24, [#allocation6], %s998_s5, %s998_s5, %s999_s28  }
  0x2d   :  { %s1000_s10 = smov [#allocation10]  }
  0x2e   :  { %s73_s11 = sshll.u32 %s1000_s10, 4  ;;  %s74_s11 = int_to_ptr.vmem [resolvable:$true] %s73_s11 }
  0x2f   :  { %s952_s12 = scalar_lea.vmem %s74_s11, 2048  ;;  %p957_p7 = scmp.lt.s32.totalorder %s74_s11, %s74_s11 }
  0x30   :  { %p953_p6 = scmp.ne.s32.totalorder %s74_s11, %s952_s12  ;;  %p958_p8 = scmp.lt.s32.totalorder %s952_s12, %s952_s12 }
  0x32   :  { %p959_p9 = por %p958_p8, %p957_p7 }
  0x34   :  { %p960_p10 = pnand %p959_p9, %p953_p6 }
  0x36   :  { %963 = shalt.err (!%p960_p10)
}
  0x37   :  { %79 = dma.hbm_to_vmem [thread:$0]  %s1102_s7, 2048, %s74_s11, [#allocation9], %s998_s5, %s998_s5, %s999_s28  }
  0x38   :  { %984 = dma.done.wait [#allocation3], 128  }
  0x39   :  { %985 = vsyncadd [#allocation3], 4294967168 }
  0x3a   :  { %986 = dma.done.wait [#allocation6], 2176  }
  0x3b   :  { %987 = vsyncadd [#allocation6], 4294965120 }
  0x3c   :  { %988 = dma.done.wait [#allocation9], 4096  }
  0x3d   :  { %989 = vsyncadd [#allocation9], 4294963200  ;;  %v1001_v0 = vmov 0   ;;  %v100_v1 = vld [vmem:[#allocation5] sm:$0xff]  ;;  %vm122_vm0 = vcmask 1043456   ;;  %v98_v2 = vld [vmem:[#allocation2] sm:$0xff]  ;;  %v103_v35 = vlaneseq }
  0x3e   :  { %161 = vmatprep.mubr.bf16.mxu0 %v1001_v0  ;;  %v698_v3 = vcombine.high %v100_v1, %v100_v1  ;;  %v697_v4 = vcombine.low %v100_v1, %v100_v1  ;;  %v808_v5 = vld [vmem:[#allocation7 + $0x78] sm:$0xff]   ;;  %v99_v8 = vpack.c.bf16 %v98_v2, %v98_v2  ;;  %v810_v9 = vld [vmem:[#allocation7 + $0x70] sm:$0xff]   ;;  %vm118_vm1 = vcmask 64512   ;;  %v812_v11 = vld [vmem:[#allocation7 + $0x68] sm:$0xff]   ;;  %s1002_s17 = smov [#allocation11]  }
  0x3f   :  { %v809_v6 = vld [vmem:[#allocation7 + $0x38] sm:$0xff]   ;;  %751 = vmatprep.subr.bf16.mxu1 %v808_v5  ;;  %v811_v10 = vld [vmem:[#allocation7 + $0x30] sm:$0xff]   ;;  %v813_v12 = vld [vmem:[#allocation7 + $0x28] sm:$0xff]   ;;  %v1068_v36 = vshrl.u32 %v103_v35, 7  ;;  %s686_s18 = sshll.u32 %s1002_s17, 4  ;;  %s687_s18 = int_to_ptr.vmem [resolvable:$true] %s686_s18 }
  0x40   :  { %699 = vmatprep.subr.msk.bf16.mxu0 %vm122_vm0, %v698_v3  ;;  %v124_v7 = vsel %vm122_vm0, %v697_v4, 0  ;;  %752 = vmatpush3.bf16.msra.mxu1 %v809_v6  ;;  %v814_v13 = vld [vmem:[#allocation7 + $0x60] sm:$0xff]   ;;  %v816_v15 = vld [vmem:[#allocation7 + $0x58] sm:$0xff]   ;;  %v818_v17 = vld [vmem:[#allocation7 + $0x50] sm:$0xff]   ;;  %s964_s19 = scalar_lea.vmem %s687_s18, 128  ;;  %p969_p12 = scmp.lt.s32.totalorder %s687_s18, %s687_s18 }
  0x41   :  { %144 = vmatpush1.bf16.msra.mxu0 %v124_v7  ;;  %753 = vmatprep.subr.bf16.mxu1 %v810_v9  ;;  %v815_v14 = vld [vmem:[#allocation7 + $0x20] sm:$0xff]   ;;  %v817_v16 = vld [vmem:[#allocation7 + $0x18] sm:$0xff]   ;;  %v819_v18 = vld [vmem:[#allocation7 + $0x10] sm:$0xff]   ;;  %v105_v37 = vsub.s32 0, %v1068_v36  ;;  %v109_v39 = vsub.s32 1, %v1068_v36  ;;  %p965_p11 = scmp.ne.s32.totalorder %s687_s18, %s964_s19  ;;  %p970_p13 = scmp.lt.s32.totalorder %s964_s19, %s964_s19 }
  0x42   :  { %v820_v19 = vld [vmem:[#allocation7 + $0x48] sm:$0xff]   ;;  %v822_v21 = vld [vmem:[#allocation7 + $0x40] sm:$0xff]   ;;  %v824_v23 = vld [vmem:[#allocation8 + $0x70] ss:$8 sps:$4 sm:$0xff]  }
  0x43   :  { %v821_v20 = vld [vmem:[#allocation7 + $0x8] sm:$0xff]   ;;  %v823_v22 = vld [vmem:[#allocation7] sm:$0xff]   ;;  %v826_v24 = vld [vmem:[#allocation8 + $0x74] ss:$8 sps:$4 sm:$0xff]   ;;  %p971_p0 = por %p970_p13, %p969_p12 }
  0x44   :  { %700 = vmatmul.mubr.msk.bf16.vlgmr.msra.gmra.mxu0 %vm118_vm1, %v99_v8  ;;  %754 = vmatpush3.bf16.msra.mxu1 %v811_v10  ;;  %v829_v25 = vld [vmem:[#allocation8 + $0x64] ss:$8 sps:$4 sm:$0xff]   ;;  %v827_v26 = vld [vmem:[#allocation8 + $0x60] ss:$8 sps:$4 sm:$0xff]   ;;  %v832_v27 = vld [vmem:[#allocation8 + $0x54] ss:$8 sps:$4 sm:$0xff]  }
  0x45   :  { %491 = vmatprep.mubr.bf16.mxu0 %v1001_v0  ;;  %755 = vmatprep.subr.bf16.mxu1 %v812_v11  ;;  %v830_v28 = vld [vmem:[#allocation8 + $0x50] ss:$8 sps:$4 sm:$0xff]   ;;  %v835_v29 = vld [vmem:[#allocation8 + $0x44] ss:$8 sps:$4 sm:$0xff]   ;;  %v833_v30 = vld [vmem:[#allocation8 + $0x40] ss:$8 sps:$4 sm:$0xff]   ;;  %p972_p1 = pnand %p971_p0, %p965_p11 }
  0x46   :  { %459 = vmatprep.subr.bf16.mxu0 %v826_v24  ;;  %v838_v31 = vld [vmem:[#allocation8 + $0x34] ss:$8 sps:$4 sm:$0xff]   ;;  %v836_v32 = vld [vmem:[#allocation8 + $0x30] ss:$8 sps:$4 sm:$0xff]   ;;  %v841_v33 = vld [vmem:[#allocation8 + $0x24] ss:$8 sps:$4 sm:$0xff]  }
  0x47   :  { %460 = vmatpush1.bf16.msra.mxu0 %v824_v23  ;;  %v839_v34 = vld [vmem:[#allocation8 + $0x20] ss:$8 sps:$4 sm:$0xff]   ;;  %v101_v38 = vld [vmem:[%s1097_s2] sm:$0x3]  ;;  %v844_v52 = vld [vmem:[#allocation8 + $0x14] ss:$8 sps:$4 sm:$0xff]  }
  0x48   :  { %756 = vmatpush3.bf16.msra.mxu1 %v813_v12  ;;  %461 = vmatprep.subr.bf16.mxu0 %v829_v25  ;;  %v106_v40 = vrot.slane %v101_v38, %v105_v37  ;;  %v110_v41 = vrot.slane %v101_v38, %v109_v39  ;;  %v842_v53 = vld [vmem:[#allocation8 + $0x10] ss:$8 sps:$4 sm:$0xff]   ;;  %v847_v54 = vld [vmem:[#allocation8 + $0x4] ss:$8 sps:$4 sm:$0xff]   ;;  %v845_v55 = vld [vmem:[#allocation8] ss:$8 sps:$4 sm:$0xff]  }
  0x49   :  { %757 = vmatprep.subr.bf16.mxu1 %v814_v13  ;;  %v848_v56 = vld [vmem:[#allocation10 + $0x78] sm:$0xff]   ;;  %v850_v58 = vld [vmem:[#allocation10 + $0x70] sm:$0xff]   ;;  %v852_v60 = vld [vmem:[#allocation10 + $0x68] sm:$0xff]  }
  0x4a   :  { %v849_v57 = vld [vmem:[#allocation10 + $0x38] sm:$0xff]   ;;  %v851_v59 = vld [vmem:[#allocation10 + $0x30] sm:$0xff]   ;;  %v853_v61 = vld [vmem:[#allocation10 + $0x28] sm:$0xff]  }
  0x4b   :  { %462 = vmatpush1.bf16.msra.mxu0 %v827_v26  ;;  %v854_v62 = vld [vmem:[#allocation10 + $0x60] sm:$0xff]   ;;  %v856_v0 = vld [vmem:[#allocation10 + $0x58] sm:$0xff]   ;;  %v858_v2 = vld [vmem:[#allocation10 + $0x50] sm:$0xff]  }
  0x4c   :  { %758 = vmatpush3.bf16.msra.mxu1 %v815_v14  ;;  %463 = vmatprep.subr.bf16.mxu0 %v832_v27  ;;  %v855_v63 = vld [vmem:[#allocation10 + $0x20] sm:$0xff]   ;;  %v857_v1 = vld [vmem:[#allocation10 + $0x18] sm:$0xff]   ;;  %v859_v3 = vld [vmem:[#allocation10 + $0x10] sm:$0xff]  }
  0x4d   :  { %759 = vmatprep.subr.bf16.mxu1 %v816_v15  ;;  %v701_v5 = vld [vmem:[%s1099_s4] ss:$0 sm:$0xff]  ;;  %v860_v13 = vld [vmem:[#allocation10 + $0x48] sm:$0xff]   ;;  %v862_v15 = vld [vmem:[#allocation10 + $0x40] sm:$0xff]  }
  0x4e   :  { %v861_v14 = vld [vmem:[#allocation10 + $0x8] sm:$0xff]  }
  0x4f   :  { %464 = vmatpush1.bf16.msra.mxu0 %v830_v28 }
  0x50   :  { %760 = vmatpush3.bf16.msra.mxu1 %v817_v16  ;;  %465 = vmatprep.subr.bf16.mxu0 %v835_v29  ;;  %v863_v16 = vld [vmem:[#allocation10] sm:$0xff]  }
  0x51   :  { %761 = vmatprep.subr.bf16.mxu1 %v818_v17  ;;  %v367_v17 = vld [vmem:[%s1101_s6] sm:$0x3] }
  0x53   :  { %466 = vmatpush1.bf16.msra.mxu0 %v833_v30 }
  0x54   :  { %762 = vmatpush3.bf16.msra.mxu1 %v819_v18  ;;  %467 = vmatprep.subr.bf16.mxu0 %v838_v31  ;;  %v372_v18 = vrot.slane %v367_v17, %v105_v37  ;;  %v734_v31 = vld [vmem:[%s1103_s8] ss:$0 sm:$0xff] }
  0x55   :  { %763 = vmatprep.subr.bf16.mxu1 %v820_v19  ;;  %v376_v19 = vrot.slane %v367_v17, %v109_v39 }
  0x57   :  { %468 = vmatpush1.bf16.msra.mxu0 %v836_v32 }
  0x58   :  { %764 = vmatpush3.bf16.msra.mxu1 %v821_v20  ;;  %469 = vmatprep.subr.bf16.mxu0 %v841_v33 }
  0x59   :  { %765 = vmatprep.subr.bf16.mxu1 %v822_v21 }
  0x5b   :  { %470 = vmatpush1.bf16.msra.mxu0 %v839_v34 }
  0x5c   :  { %766 = vmatpush3.bf16.msra.mxu1 %v823_v22  ;;  %471 = vmatprep.subr.bf16.mxu0 %v844_v52 }
  0x5d   :  { %773 = vmatprep.subr.bf16.mxu1 %v848_v56 }
  0x5f   :  { %472 = vmatpush1.bf16.msra.mxu0 %v842_v53 }
  0x60   :  { %473 = vmatprep.subr.bf16.mxu0 %v847_v54 }
  0x63   :  { %474 = vmatpush1.bf16.msra.mxu0 %v845_v55 }
 0x104   :  { %v163_v42 = vpop.f32.mrf.mxu0 }
 0x105   :  { %v164_v43 = vadd.f32 %v163_v42, %v106_v40 }
 0x106   :  { %v165_v44 = vpop.f32.mrf.mxu0 }
 0x107   :  { %v166_v45 = vadd.f32 %v165_v44, %v110_v41  ;;  %v170_v46 = vmax.f32 %v164_v43, 0.0 }
 0x108   :  { %v167_v47 = vpop.f32.mrf.mxu0 }
 0x109   :  { %v171_v48 = vmax.f32 %v166_v45, 0.0  ;;  %v172_v51 = vpack.c.bf16 %v170_v46, %v170_v46 }
 0x10a   :  { %v168_v49 = vpop.f32.mrf.mxu0 }
 0x10b   :  { %v173_v50 = vpack.c.bf16 %v171_v48, %v171_v48 }
 0x10d   :  { %341 = vmatprep.mubr.bf16.mxu1 %v173_v50 }
 0x10e   :  { %342 = vmatmul.mubr.bf16.vlgmr.msra.gmra.mxu1 %v172_v51 }
 0x10f   :  { %774 = vmatpush3.bf16.msra.mxu1 %v849_v57 }
 0x110   :  { %775 = vmatprep.subr.bf16.mxu1 %v850_v58 }
 0x113   :  { %776 = vmatpush3.bf16.msra.mxu1 %v851_v59 }
 0x114   :  { %777 = vmatprep.subr.bf16.mxu1 %v852_v60 }
 0x117   :  { %778 = vmatpush3.bf16.msra.mxu1 %v853_v61 }
 0x118   :  { %779 = vmatprep.subr.bf16.mxu1 %v854_v62 }
 0x11b   :  { %780 = vmatpush3.bf16.msra.mxu1 %v855_v63 }
 0x11c   :  { %781 = vmatprep.subr.bf16.mxu1 %v856_v0 }
 0x11f   :  { %782 = vmatpush3.bf16.msra.mxu1 %v857_v1 }
 0x120   :  { %783 = vmatprep.subr.bf16.mxu1 %v858_v2 }
 0x123   :  { %784 = vmatpush3.bf16.msra.mxu1 %v859_v3 }
 0x124   :  { %785 = vmatprep.subr.bf16.mxu1 %v860_v13 }
 0x127   :  { %786 = vmatpush3.bf16.msra.mxu1 %v861_v14 }
 0x128   :  { %787 = vmatprep.subr.bf16.mxu1 %v862_v15 }
 0x12b   :  { %788 = vmatpush3.bf16.msra.mxu1 %v863_v16 }
 0x1ce   :  { %v767_v4 = vpop.f32.mrf.mxu1 }
 0x1d0   :  { %v768_v6 = vpop.f32.mrf.mxu1 }
 0x1d1   :  { %v769_v7 = vadd.f32 %v768_v6, %v767_v4 }
 0x1d2   :  { %v770_v8 = vpop.f32.mrf.mxu1 }
 0x1d3   :  { %v344_v9 = vadd.f32 %v769_v7, %v701_v5 }
 0x1d4   :  { %v771_v10 = vpop.f32.mrf.mxu1 }
 0x1d5   :  { %v349_v11 = vmax.f32 %v344_v9, 0.0 }
 0x1d7   :  { %v350_v12 = vpack.c.bf16 %v349_v11, %v349_v11 }
 0x1d9   :  { %492 = vmatmul.mubr.bf16.vlgmr.msra.gmra.mxu0 %v350_v12 }
 0x299   :  { %v493_v20 = vpop.f32.mrf.mxu0 }
 0x29a   :  { %v494_v21 = vadd.f32 %v493_v20, %v372_v18 }
 0x29b   :  { %v495_v22 = vpop.f32.mrf.mxu0 }
 0x29c   :  { %v496_v23 = vadd.f32 %v495_v22, %v376_v19  ;;  %v500_v24 = vmax.f32 %v494_v21, 0.0 }
 0x29d   :  { %v497_v25 = vpop.f32.mrf.mxu0 }
 0x29e   :  { %v501_v26 = vmax.f32 %v496_v23, 0.0  ;;  %v502_v29 = vpack.c.bf16 %v500_v24, %v500_v24 }
 0x29f   :  { %v498_v27 = vpop.f32.mrf.mxu0 }
 0x2a0   :  { %v503_v28 = vpack.c.bf16 %v501_v26, %v501_v26 }
 0x2a2   :  { %671 = vmatprep.mubr.bf16.mxu1 %v503_v28 }
 0x2a3   :  { %672 = vmatmul.mubr.bf16.vlgmr.msra.gmra.mxu1 %v502_v29 }
 0x363   :  { %v789_v30 = vpop.f32.mrf.mxu1 }
 0x365   :  { %v790_v32 = vpop.f32.mrf.mxu1 }
 0x366   :  { %v791_v33 = vadd.f32 %v790_v32, %v789_v30 }
 0x367   :  { %v792_v34 = vpop.f32.mrf.mxu1 }
 0x368   :  { %v674_v35 = vadd.f32 %v791_v33, %v734_v31 }
 0x369   :  { %v793_v36 = vpop.f32.mrf.mxu1 }
 0x36a   :  { %679 = vst [vmem:[#allocation11] sm:$0xff] %v674_v35 }
 0x36b   :  { %975 = shalt.err (!%p972_p1)
}
 0x36c   :  { %689 = dma.vmem_to_hbm [thread:$0]  %s687_s18, 128, %s1104_s9, [#allocation4]  }
 0x36d   :  { %990 = dma.done.wait [#allocation4], 128  }
 0x36e   :  { %991 = vsyncadd [#allocation4], 4294967168 }
 0x36f   :  { %693 = vsyncpa [#allocation3], 1 }
 0x370   :  { %694 = vsyncpa [#allocation6], 1 }
 0x371   :  { %695 = vsyncpa [#allocation9], 1 }
 0x372   :  { %696 = vsyncpa [#allocation4], 1 }

</bundles_post_ra>
